<compile_context>
chip_gen: v7x
topology: tpu7x:2x2x1
jax: 0.10.0
libtpu: 0.0.40
codegen_flags: <defaults>
</compile_context>

<pallas_src>
import jax
import jax.numpy as jnp
from jax.experimental import pallas as pl
from jax.experimental.pallas import tpu as pltpu

HIDDEN = 32      # hidden_size
OUTPUT = 64      # output_size (vocab)
MAXLEN = 10      # max_length
N_LAYERS = 1     # n_layers
DROPOUT_P = 0.1  # eval mode -> identity

# Column offsets inside the packed bf16 weight slab (128-lane aligned blocks).
C_ATTN = 0                      # (2H, L)   rows [emb; hid]
C_COMB = 128                    # (2H, H)   rows [emb; attn_applied]
C_GRU = 256                     # (2H, 6H)  block-diag [[W_ih, 0], [0, W_hh]], gates [r|z|n]
C_OUT = 512                     # (H, V)    output projection (rows 0:H)
SLAB_COLS = 640
SLAB_ROWS = 2 * HIDDEN          # 64
PACK_W = 128                    # packed per-step output row: [logp(V) | h(H) | aw(L) | pad]


def attn_decoder_kernel(tok_ref, emb_tab_ref, hid0_ref, enc_ref, w_ref, b_ref,
                        out_ref, hid_scr):
    f32, bf16 = jnp.float32, jnp.bfloat16
    H, L, V = HIDDEN, MAXLEN, OUTPUT
    t = pl.program_id(0)

    # Hidden state lives in VMEM scratch across all grid steps; seed at step 0.
    @pl.when(t == 0)
    def _():
        hid_scr[...] = hid0_ref[...]

    # --- embedding lookup (dropout = identity in eval mode) ---
    tok = tok_ref[t]
    emb = emb_tab_ref[pl.ds(tok, 1), :]                       # (1, H) f32
    h = hid_scr[...]                                          # (1, H) f32

    # --- attention weights: softmax([emb | hid] @ W_attn + b_attn) ---
    xh = jnp.concatenate([emb, h], axis=1).astype(bf16)       # (1, 2H), register concat
    logits = (jnp.dot(xh, w_ref[:, C_ATTN:C_ATTN + L],
                      preferred_element_type=f32)
              + b_ref[:, C_ATTN:C_ATTN + L])                  # (1, L) f32
    m = jnp.max(logits, axis=1, keepdims=True)
    e = jnp.exp(logits - m)
    aw = e * pl.reciprocal(jnp.sum(e, axis=1, keepdims=True), approx=True)  # (1, L)

    # --- attn_applied = attn_weights @ encoder_outputs (tiny dot, kept f32) ---
    attn_applied = jnp.dot(aw, enc_ref[...], preferred_element_type=f32)    # (1, H)

    # --- attn_combine([emb | attn_applied]) ---
    xa = jnp.concatenate([emb, attn_applied], axis=1).astype(bf16)          # (1, 2H)
    x = (jnp.dot(xa, w_ref[:, C_COMB:C_COMB + H], preferred_element_type=f32)
         + b_ref[:, C_COMB:C_COMB + H])                       # (1, H) f32

    # --- relu + GRU cell: ONE block-diagonal dot gives [gi | gh] ---
    for _ in range(N_LAYERS):                                 # module reuses one GRU
        x = jnp.maximum(x, 0.0)
        xg = jnp.concatenate([x, h], axis=1).astype(bf16)     # (1, 2H)
        g = (jnp.dot(xg, w_ref[:, C_GRU:C_GRU + 6 * H],
                     preferred_element_type=f32)
             + b_ref[:, C_GRU:C_GRU + 6 * H])                 # (1, 6H) = [gi | gh]
        gi = g[:, 0:3 * H]
        gh = g[:, 3 * H:6 * H]
        r = jax.nn.sigmoid(gi[:, 0:H] + gh[:, 0:H])
        z = jax.nn.sigmoid(gi[:, H:2 * H] + gh[:, H:2 * H])
        n = jnp.tanh(gi[:, 2 * H:3 * H] + r * gh[:, 2 * H:3 * H])  # PyTorch GRU rule
        h = (1.0 - z) * n + z * h
        x = h                                                 # GRU output == new hidden
    hid_scr[...] = h                                          # carry to next step

    # --- log_softmax(out(h)) ---
    o = (jnp.dot(h.astype(bf16), w_ref[0:H, C_OUT:C_OUT + V],
                 preferred_element_type=f32)
         + b_ref[:, C_OUT:C_OUT + V])                         # (1, V)
    mo = jnp.max(o, axis=1, keepdims=True)
    sh = o - mo
    logp = sh - jnp.log(jnp.sum(jnp.exp(sh), axis=1, keepdims=True))

    # --- single full-width lane-dense row store: [logp | h | aw | zeros] ---
    pad = jnp.zeros((1, PACK_W - V - H - L), f32)
    out_ref[pl.ds(t, 1), :] = jnp.concatenate([logp, h, aw, pad], axis=1)


def _decode_impl(params, token_ids, hidden, encoder_outputs):
    """Run T decode steps in one pallas_call (teacher-forced token ids)."""
    T = token_ids.shape[0]
    toks = token_ids.astype(jnp.int32)
    hid0 = hidden.reshape(1, HIDDEN).astype(jnp.float32)
    enc = encoder_outputs.astype(jnp.float32)

    grid_spec = pltpu.PrefetchScalarGridSpec(
        num_scalar_prefetch=1,
        grid=(T,),
        in_specs=[
            pl.BlockSpec((OUTPUT, HIDDEN), lambda t, tok: (0, 0)),       # emb table
            pl.BlockSpec((1, HIDDEN), lambda t, tok: (0, 0)),            # initial hidden
            pl.BlockSpec((MAXLEN, HIDDEN), lambda t, tok: (0, 0)),       # encoder outputs
            pl.BlockSpec((SLAB_ROWS, SLAB_COLS), lambda t, tok: (0, 0)),  # bf16 weight slab
            pl.BlockSpec((1, SLAB_COLS), lambda t, tok: (0, 0)),         # f32 bias slab
        ],
        out_specs=pl.BlockSpec((T, PACK_W), lambda t, tok: (0, 0)),      # resident, flushed once
        scratch_shapes=[pltpu.VMEM((1, HIDDEN), jnp.float32)],           # carried hidden state
    )
    packed = pl.pallas_call(
        attn_decoder_kernel,
        out_shape=jax.ShapeDtypeStruct((T, PACK_W), jnp.float32),
        grid_spec=grid_spec,
        compiler_params=pltpu.CompilerParams(dimension_semantics=("arbitrary",)),
    )(toks, params["emb_tab"], hid0, enc, params["w_slab"], params["b_slab"])

    logp = packed[:, 0:OUTPUT]                                           # (T, V)
    new_hidden = packed[T - 1, OUTPUT:OUTPUT + HIDDEN].reshape(1, 1, HIDDEN)
    attn_w = packed[:, OUTPUT + HIDDEN:OUTPUT + HIDDEN + MAXLEN]         # (T, L)
    return logp, new_hidden, attn_w


attn_decoder_decode = jax.jit(_decode_impl)


def attn_decoder_forward(params, input_idx, hidden, encoder_outputs):
    """Single-step forward matching AttnDecoderRNN.forward (eval mode)."""
    toks = jnp.asarray(input_idx, jnp.int32).reshape(1)
    return attn_decoder_decode(params, toks, hidden, encoder_outputs)


def init_params(key):
    """Deterministic synthetic init. Real PyTorch weights would be transposed to
    (in, out) layout, bf16-rounded and packed into the same slab positions."""
    H, L, V = HIDDEN, MAXLEN, OUTPUT
    ks = jax.random.split(key, 11)
    s = 0.1

    def rnd_bf16(k, shape):  # bf16-rounded master copy (kernel uses bf16 slab)
        w = jax.random.normal(k, shape, jnp.float32) * s
        return w.astype(jnp.bfloat16).astype(jnp.float32)

    emb_tab = jax.random.normal(ks[0], (V, H), jnp.float32) * s   # 2D (V, H) table
    w_attn = rnd_bf16(ks[1], (2 * H, L))                          # rows [emb; hid]
    b_attn = jax.random.normal(ks[2], (L,), jnp.float32) * s
    w_comb = rnd_bf16(ks[3], (2 * H, H))                          # rows [emb; applied]
    b_comb = jax.random.normal(ks[4], (H,), jnp.float32) * s
    w_gi = rnd_bf16(ks[5], (H, 3 * H))                            # cols [r|z|n]
    b_gi = jax.random.normal(ks[6], (3 * H,), jnp.float32) * s
    w_gh = rnd_bf16(ks[7], (H, 3 * H))                            # cols [r|z|n]
    b_gh = jax.random.normal(ks[8], (3 * H,), jnp.float32) * s
    w_out = rnd_bf16(ks[9], (H, V))
    b_out = jax.random.normal(ks[10], (V,), jnp.float32) * s

    w_slab = jnp.zeros((SLAB_ROWS, SLAB_COLS), jnp.float32)
    w_slab = w_slab.at[:, C_ATTN:C_ATTN + L].set(w_attn)
    w_slab = w_slab.at[:, C_COMB:C_COMB + H].set(w_comb)
    w_slab = w_slab.at[0:H, C_GRU:C_GRU + 3 * H].set(w_gi)                 # block-diag
    w_slab = w_slab.at[H:2 * H, C_GRU + 3 * H:C_GRU + 6 * H].set(w_gh)     # block-diag
    w_slab = w_slab.at[0:H, C_OUT:C_OUT + V].set(w_out)
    w_slab = w_slab.astype(jnp.bfloat16)

    b_slab = jnp.zeros((1, SLAB_COLS), jnp.float32)
    b_slab = b_slab.at[0, C_ATTN:C_ATTN + L].set(b_attn)
    b_slab = b_slab.at[0, C_COMB:C_COMB + H].set(b_comb)
    b_slab = b_slab.at[0, C_GRU:C_GRU + 3 * H].set(b_gi)
    b_slab = b_slab.at[0, C_GRU + 3 * H:C_GRU + 6 * H].set(b_gh)
    b_slab = b_slab.at[0, C_OUT:C_OUT + V].set(b_out)

    return {
        # kernel operands
        "emb_tab": emb_tab, "w_slab": w_slab, "b_slab": b_slab,
        # f32 (bf16-rounded) logical copies for the pure-JAX reference
        "w_attn": w_attn, "b_attn": b_attn, "w_comb": w_comb, "b_comb": b_comb,
        "w_gi": w_gi, "b_gi": b_gi, "w_gh": w_gh, "b_gh": b_gh,
        "w_out": w_out, "b_out": b_out,
    }


def reference_decode(params, token_ids, hidden, encoder_outputs):
    """Pure-JAX f32 reference of the same multi-step forward (eval mode)."""
    H = HIDDEN
    h = hidden.reshape(1, H).astype(jnp.float32)
    enc = encoder_outputs.astype(jnp.float32)
    logps, aws = [], []
    for t in range(token_ids.shape[0]):
        tok = int(token_ids[t])
        emb = params["emb_tab"][tok].reshape(1, H)
        xh = jnp.concatenate([emb, h], axis=1)
        aw = jax.nn.softmax(xh @ params["w_attn"] + params["b_attn"], axis=1)
        applied = aw @ enc
        x = jnp.concatenate([emb, applied], axis=1) @ params["w_comb"] + params["b_comb"]
        for _ in range(N_LAYERS):
            x = jnp.maximum(x, 0.0)
            gi = x @ params["w_gi"] + params["b_gi"]
            gh = h @ params["w_gh"] + params["b_gh"]
            r = jax.nn.sigmoid(gi[:, 0:H] + gh[:, 0:H])
            z = jax.nn.sigmoid(gi[:, H:2 * H] + gh[:, H:2 * H])
            n = jnp.tanh(gi[:, 2 * H:3 * H] + r * gh[:, 2 * H:3 * H])
            h = (1.0 - z) * n + z * h
            x = h
        logp = jax.nn.log_softmax(h @ params["w_out"] + params["b_out"], axis=1)
        logps.append(logp)
        aws.append(aw)
    return (jnp.concatenate(logps, axis=0), h.reshape(1, 1, H),
            jnp.concatenate(aws, axis=0))


if __name__ == "__main__":
    key = jax.random.PRNGKey(0)
    kp, ke, kt = jax.random.split(key, 3)
    params = init_params(kp)

    T = 8
    token_ids = jax.random.randint(kt, (T,), 0, OUTPUT, dtype=jnp.int32)
    hidden = jnp.zeros((1, 1, HIDDEN), jnp.float32)                   # initHidden()
    encoder_outputs = jax.random.normal(ke, (MAXLEN, HIDDEN), jnp.float32) * 0.1
    # NOTE: the unused `encoder_output` (singular) forward arg is omitted.
    # TODO(synk): training-mode dropout (p=0.1) not implemented; eval-mode identity used.

    # Multi-step fused decode (one pallas_call for all T tokens).
    log_probs, new_hidden, attn_weights = attn_decoder_decode(
        params, token_ids, hidden, encoder_outputs)
    jax.block_until_ready((log_probs, new_hidden, attn_weights))
    assert log_probs.shape == (T, OUTPUT)
    assert new_hidden.shape == (1, 1, HIDDEN)
    assert attn_weights.shape == (T, MAXLEN)

    # Numerical check vs. pure-JAX f32 reference (bf16 weights + approx rcp ->
    # loose tolerance).
    ref_lp, ref_h, ref_aw = reference_decode(params, token_ids, hidden, encoder_outputs)
    assert jnp.max(jnp.abs(log_probs - ref_lp)) < 5e-2
    assert jnp.max(jnp.abs(new_hidden - ref_h)) < 5e-2
    assert jnp.max(jnp.abs(attn_weights - ref_aw)) < 5e-2

    # Single-step API matching AttnDecoderRNN.forward.
    lp1, h1, aw1 = attn_decoder_forward(params, jnp.array(5, jnp.int32),
                                        hidden, encoder_outputs)
    jax.block_until_ready((lp1, h1, aw1))
    assert lp1.shape == (1, OUTPUT)
    assert h1.shape == (1, 1, HIDDEN)
    assert aw1.shape == (1, MAXLEN)

    print("KERNEL_OK")
</pallas_src>

<mosaic_0001>
module attributes {stable_mosaic.version = 11 : i64} {
  func.func @attn_decoder_kernel(%arg0: i32, %arg1: memref<8xi32, #tpu.memory_space<smem>>, %arg2: memref<64x32xf32, #tpu.memory_space<vmem>>, %arg3: memref<1x32xf32, #tpu.memory_space<vmem>>, %arg4: memref<10x32xf32, #tpu.memory_space<vmem>>, %arg5: memref<64x640xbf16, #tpu.memory_space<vmem>>, %arg6: memref<1x640xf32, #tpu.memory_space<vmem>>, %arg7: memref<8x128xf32, #tpu.memory_space<vmem>>, %arg8: memref<1x32xf32, #tpu.memory_space<vmem>>) attributes {dimension_semantics = [#tpu.dimension_semantics<arbitrary>], iteration_bounds = array<i64: 8>, scalar_prefetch = 1 : i64, scratch_operands = 1 : i64, tpu.core_type = #tpu.core_type<tc>, window_params = [{pipeline_mode = #tpu.pipeline_mode<synchronous>, transform_indices = @transform_0, window_bounds = array<i64: 64, 32>}, {pipeline_mode = #tpu.pipeline_mode<synchronous>, transform_indices = @transform_1, window_bounds = array<i64: 1, 32>}, {pipeline_mode = #tpu.pipeline_mode<synchronous>, transform_indices = @transform_2, window_bounds = array<i64: 10, 32>}, {pipeline_mode = #tpu.pipeline_mode<synchronous>, transform_indices = @transform_3, window_bounds = array<i64: 64, 640>}, {pipeline_mode = #tpu.pipeline_mode<synchronous>, transform_indices = @transform_4, window_bounds = array<i64: 1, 640>}, {pipeline_mode = #tpu.pipeline_mode<synchronous>, transform_indices = @transform_5, window_bounds = array<i64: 8, 128>}]} {
    %c0_i32 = arith.constant 0 : i32
    %0 = arith.cmpi eq, %arg0, %c0_i32 : i32
    %1 = arith.extui %0 : i1 to i32
    %c0_i32_0 = arith.constant 0 : i32
    %2 = arith.cmpi ne, %1, %c0_i32_0 : i32
    scf.if %2 {
      %c0_34 = arith.constant 0 : index
      %c0_35 = arith.constant 0 : index
      %88 = vector.load %arg3[%c0_34, %c0_35] : memref<1x32xf32, #tpu.memory_space<vmem>>, vector<1x32xf32>
      %c0_36 = arith.constant 0 : index
      %c0_37 = arith.constant 0 : index
      %89 = vector.load %arg8[%c0_36, %c0_37] : memref<1x32xf32, #tpu.memory_space<vmem>>, vector<1x32xf32>
      tpu.vector_store %arg8[%c0_36, %c0_37], %88 {strides = array<i32>} : memref<1x32xf32, #tpu.memory_space<vmem>>, vector<1x32xf32>,
    } else {
    }
    %3 = arith.index_cast %arg0 : i32 to index
    %4 = memref.load %arg1[%3] : memref<8xi32, #tpu.memory_space<smem>>
    %5 = arith.index_cast %4 : i32 to index
    %c0 = arith.constant 0 : index
    %6 = vector.load %arg2[%5, %c0] : memref<64x32xf32, #tpu.memory_space<vmem>>, vector<1x32xf32>
    %c0_1 = arith.constant 0 : index
    %c0_2 = arith.constant 0 : index
    %7 = vector.load %arg8[%c0_1, %c0_2] : memref<1x32xf32, #tpu.memory_space<vmem>>, vector<1x32xf32>
    %8 = tpu.concatenate %6, %7 in 1 : vector<1x32xf32>, vector<1x32xf32> -> vector<1x64xf32>
    %9 = arith.truncf %8 : vector<1x64xf32> to vector<1x64xbf16>
    %c0_3 = arith.constant 0 : index
    %c0_4 = arith.constant 0 : index
    %10 = vector.load %arg5[%c0_3, %c0_4] : memref<64x640xbf16, #tpu.memory_space<vmem>>, vector<64x10xbf16>
    %cst = arith.constant dense<0.000000e+00> : vector<1x10xf32>
    %11 = tpu.matmul %9, %10, %cst {dimension_numbers = #tpu.dot_dimension_numbers<[1], [0], [0], [1], [0, 0, 1, 1], [], []>} : vector<1x64xbf16>, vector<64x10xbf16>, vector<1x10xf32> -> vector<1x10xf32>
    %c0_5 = arith.constant 0 : index
    %c0_6 = arith.constant 0 : index
    %12 = vector.load %arg6[%c0_5, %c0_6] : memref<1x640xf32, #tpu.memory_space<vmem>>, vector<1x10xf32>
    %13 = arith.addf %11, %12 : vector<1x10xf32>
    %cst_7 = arith.constant dense<0xFF800000> : vector<1xf32>
    %14 = vector.multi_reduction <maximumf>, %13, %cst_7 [1] : vector<1x10xf32> to vector<1xf32>
    %15 = vector.shape_cast %14 : vector<1xf32> to vector<1x1xf32>
    %16 = vector.broadcast %15 : vector<1x1xf32> to vector<1x10xf32>
    %17 = arith.subf %13, %16 : vector<1x10xf32>
    %18 = math.exp %17 : vector<1x10xf32>
    %cst_8 = arith.constant dense<0.000000e+00> : vector<1xf32>
    %19 = vector.multi_reduction <add>, %18, %cst_8 [1] : vector<1x10xf32> to vector<1xf32>
    %20 = vector.shape_cast %19 : vector<1xf32> to vector<1x1xf32>
    %21 = tpu.reciprocal %20 {approx = true} : vector<1x1xf32> -> vector<1x1xf32>
    %22 = vector.broadcast %21 : vector<1x1xf32> to vector<1x10xf32>
    %23 = arith.mulf %18, %22 : vector<1x10xf32>
    %c0_9 = arith.constant 0 : index
    %c0_10 = arith.constant 0 : index
    %24 = vector.load %arg4[%c0_9, %c0_10] : memref<10x32xf32, #tpu.memory_space<vmem>>, vector<10x32xf32>
    %cst_11 = arith.constant dense<0.000000e+00> : vector<1x32xf32>
    %25 = tpu.matmul %23, %24, %cst_11 {dimension_numbers = #tpu.dot_dimension_numbers<[1], [0], [0], [1], [0, 0, 1, 1], [], []>} : vector<1x10xf32>, vector<10x32xf32>, vector<1x32xf32> -> vector<1x32xf32>
    %26 = tpu.concatenate %6, %25 in 1 : vector<1x32xf32>, vector<1x32xf32> -> vector<1x64xf32>
    %27 = arith.truncf %26 : vector<1x64xf32> to vector<1x64xbf16>
    %c0_12 = arith.constant 0 : index
    %c128 = arith.constant 128 : index
    %28 = vector.load %arg5[%c0_12, %c128] : memref<64x640xbf16, #tpu.memory_space<vmem>>, vector<64x32xbf16>
    %cst_13 = arith.constant dense<0.000000e+00> : vector<1x32xf32>
    %29 = tpu.matmul %27, %28, %cst_13 {dimension_numbers = #tpu.dot_dimension_numbers<[1], [0], [0], [1], [0, 0, 1, 1], [], []>} : vector<1x64xbf16>, vector<64x32xbf16>, vector<1x32xf32> -> vector<1x32xf32>
    %c0_14 = arith.constant 0 : index
    %c128_15 = arith.constant 128 : index
    %30 = vector.load %arg6[%c0_14, %c128_15] : memref<1x640xf32, #tpu.memory_space<vmem>>, vector<1x32xf32>
    %31 = arith.addf %29, %30 : vector<1x32xf32>
    %cst_16 = arith.constant 0.000000e+00 : f32
    %32 = vector.broadcast %cst_16 : f32 to vector<1x32xf32>
    %33 = arith.maximumf %31, %32 : vector<1x32xf32>
    %34 = tpu.concatenate %33, %7 in 1 : vector<1x32xf32>, vector<1x32xf32> -> vector<1x64xf32>
    %35 = arith.truncf %34 : vector<1x64xf32> to vector<1x64xbf16>
    %c0_17 = arith.constant 0 : index
    %c256 = arith.constant 256 : index
    %36 = vector.load %arg5[%c0_17, %c256] : memref<64x640xbf16, #tpu.memory_space<vmem>>, vector<64x192xbf16>
    %cst_18 = arith.constant dense<0.000000e+00> : vector<1x192xf32>
    %37 = tpu.matmul %35, %36, %cst_18 {dimension_numbers = #tpu.dot_dimension_numbers<[1], [0], [0], [1], [0, 0, 1, 1], [], []>} : vector<1x64xbf16>, vector<64x192xbf16>, vector<1x192xf32> -> vector<1x192xf32>
    %c0_19 = arith.constant 0 : index
    %c256_20 = arith.constant 256 : index
    %38 = vector.load %arg6[%c0_19, %c256_20] : memref<1x640xf32, #tpu.memory_space<vmem>>, vector<1x192xf32>
    %39 = arith.addf %37, %38 : vector<1x192xf32>
    %40 = vector.extract_strided_slice %39 {offsets = [0, 0], sizes = [1, 96], strides = [1, 1]} : vector<1x192xf32> to vector<1x96xf32>
    %41 = vector.extract_strided_slice %39 {offsets = [0, 96], sizes = [1, 96], strides = [1, 1]} : vector<1x192xf32> to vector<1x96xf32>
    %42 = vector.extract_strided_slice %40 {offsets = [0, 0], sizes = [1, 32], strides = [1, 1]} : vector<1x96xf32> to vector<1x32xf32>
    %43 = vector.extract_strided_slice %41 {offsets = [0, 0], sizes = [1, 32], strides = [1, 1]} : vector<1x96xf32> to vector<1x32xf32>
    %44 = arith.addf %42, %43 : vector<1x32xf32>
    %45 = arith.negf %44 : vector<1x32xf32>
    %46 = math.exp %45 : vector<1x32xf32>
    %cst_21 = arith.constant 1.000000e+00 : f32
    %47 = vector.broadcast %cst_21 : f32 to vector<1x32xf32>
    %48 = arith.addf %47, %46 : vector<1x32xf32>
    %49 = arith.divf %47, %48 : vector<1x32xf32>
    %50 = vector.extract_strided_slice %40 {offsets = [0, 32], sizes = [1, 32], strides = [1, 1]} : vector<1x96xf32> to vector<1x32xf32>
    %51 = vector.extract_strided_slice %41 {offsets = [0, 32], sizes = [1, 32], strides = [1, 1]} : vector<1x96xf32> to vector<1x32xf32>
    %52 = arith.addf %50, %51 : vector<1x32xf32>
    %53 = arith.negf %52 : vector<1x32xf32>
    %54 = math.exp %53 : vector<1x32xf32>
    %cst_22 = arith.constant 1.000000e+00 : f32
    %55 = vector.broadcast %cst_22 : f32 to vector<1x32xf32>
    %56 = arith.addf %55, %54 : vector<1x32xf32>
    %57 = arith.divf %55, %56 : vector<1x32xf32>
    %58 = vector.extract_strided_slice %40 {offsets = [0, 64], sizes = [1, 32], strides = [1, 1]} : vector<1x96xf32> to vector<1x32xf32>
    %59 = vector.extract_strided_slice %41 {offsets = [0, 64], sizes = [1, 32], strides = [1, 1]} : vector<1x96xf32> to vector<1x32xf32>
    %60 = arith.mulf %49, %59 : vector<1x32xf32>
    %61 = arith.addf %58, %60 : vector<1x32xf32>
    %62 = math.tanh %61 : vector<1x32xf32>
    %cst_23 = arith.constant 1.000000e+00 : f32
    %63 = vector.broadcast %cst_23 : f32 to vector<1x32xf32>
    %64 = arith.subf %63, %57 : vector<1x32xf32>
    %65 = arith.mulf %64, %62 : vector<1x32xf32>
    %66 = arith.mulf %57, %7 : vector<1x32xf32>
    %67 = arith.addf %65, %66 : vector<1x32xf32>
    %c0_24 = arith.constant 0 : index
    %c0_25 = arith.constant 0 : index
    %68 = vector.load %arg8[%c0_24, %c0_25] : memref<1x32xf32, #tpu.memory_space<vmem>>, vector<1x32xf32>
    tpu.vector_store %arg8[%c0_24, %c0_25], %67 {strides = array<i32>} : memref<1x32xf32, #tpu.memory_space<vmem>>, vector<1x32xf32>,
    %69 = arith.truncf %67 : vector<1x32xf32> to vector<1x32xbf16>
    %c0_26 = arith.constant 0 : index
    %c512 = arith.constant 512 : index
    %70 = vector.load %arg5[%c0_26, %c512] : memref<64x640xbf16, #tpu.memory_space<vmem>>, vector<32x64xbf16>
    %cst_27 = arith.constant dense<0.000000e+00> : vector<1x64xf32>
    %71 = tpu.matmul %69, %70, %cst_27 {dimension_numbers = #tpu.dot_dimension_numbers<[1], [0], [0], [1], [0, 0, 1, 1], [], []>} : vector<1x32xbf16>, vector<32x64xbf16>, vector<1x64xf32> -> vector<1x64xf32>
    %c0_28 = arith.constant 0 : index
    %c512_29 = arith.constant 512 : index
    %72 = vector.load %arg6[%c0_28, %c512_29] : memref<1x640xf32, #tpu.memory_space<vmem>>, vector<1x64xf32>
    %73 = arith.addf %71, %72 : vector<1x64xf32>
    %cst_30 = arith.constant dense<0xFF800000> : vector<1xf32>
    %74 = vector.multi_reduction <maximumf>, %73, %cst_30 [1] : vector<1x64xf32> to vector<1xf32>
    %75 = vector.shape_cast %74 : vector<1xf32> to vector<1x1xf32>
    %76 = vector.broadcast %75 : vector<1x1xf32> to vector<1x64xf32>
    %77 = arith.subf %73, %76 : vector<1x64xf32>
    %78 = math.exp %77 : vector<1x64xf32>
    %cst_31 = arith.constant dense<0.000000e+00> : vector<1xf32>
    %79 = vector.multi_reduction <add>, %78, %cst_31 [1] : vector<1x64xf32> to vector<1xf32>
    %80 = vector.shape_cast %79 : vector<1xf32> to vector<1x1xf32>
    %81 = math.log %80 : vector<1x1xf32>
    %82 = vector.broadcast %81 : vector<1x1xf32> to vector<1x64xf32>
    %83 = arith.subf %77, %82 : vector<1x64xf32>
    %cst_32 = arith.constant 0.000000e+00 : f32
    %84 = vector.broadcast %cst_32 : f32 to vector<1x22xf32>
    %85 = tpu.concatenate %83, %67, %23, %84 in 1 : vector<1x64xf32>, vector<1x32xf32>, vector<1x10xf32>, vector<1x22xf32> -> vector<1x128xf32>
    %86 = arith.index_cast %arg0 : i32 to index
    %c0_33 = arith.constant 0 : index
    %87 = vector.load %arg7[%86, %c0_33] : memref<8x128xf32, #tpu.memory_space<vmem>>, vector<1x128xf32>
    tpu.vector_store %arg7[%86, %c0_33], %85 {strides = array<i32>} : memref<8x128xf32, #tpu.memory_space<vmem>>, vector<1x128xf32>,
    return
  }
  func.func @transform_0(%arg0: i32, %arg1: memref<8xi32, #tpu.memory_space<smem>>) -> (i32, i32) {
    %c0_i32 = arith.constant 0 : i32
    %c0_i32_0 = arith.constant 0 : i32
    %c0_i32_1 = arith.constant 0 : i32
    return %c0_i32, %c0_i32_0 : i32, i32
  }
  func.func @transform_1(%arg0: i32, %arg1: memref<8xi32, #tpu.memory_space<smem>>) -> (i32, i32) {
    %c0_i32 = arith.constant 0 : i32
    %c0_i32_0 = arith.constant 0 : i32
    %c0_i32_1 = arith.constant 0 : i32
    return %c0_i32, %c0_i32_0 : i32, i32
  }
  func.func @transform_2(%arg0: i32, %arg1: memref<8xi32, #tpu.memory_space<smem>>) -> (i32, i32) {
    %c0_i32 = arith.constant 0 : i32
    %c0_i32_0 = arith.constant 0 : i32
    %c0_i32_1 = arith.constant 0 : i32
    return %c0_i32, %c0_i32_0 : i32, i32
  }
  func.func @transform_3(%arg0: i32, %arg1: memref<8xi32, #tpu.memory_space<smem>>) -> (i32, i32) {
    %c0_i32 = arith.constant 0 : i32
    %c0_i32_0 = arith.constant 0 : i32
    %c0_i32_1 = arith.constant 0 : i32
    return %c0_i32, %c0_i32_0 : i32, i32
  }
  func.func @transform_4(%arg0: i32, %arg1: memref<8xi32, #tpu.memory_space<smem>>) -> (i32, i32) {
    %c0_i32 = arith.constant 0 : i32
    %c0_i32_0 = arith.constant 0 : i32
    %c0_i32_1 = arith.constant 0 : i32
    return %c0_i32, %c0_i32_0 : i32, i32
  }
  func.func @transform_5(%arg0: i32, %arg1: memref<8xi32, #tpu.memory_space<smem>>) -> (i32, i32) {
    %c0_i32 = arith.constant 0 : i32
    %c0_i32_0 = arith.constant 0 : i32
    %c0_i32_1 = arith.constant 0 : i32
    return %c0_i32, %c0_i32_0 : i32, i32
  }
}

</mosaic_0001>

<bundles_post_ra>
// kernel: _decode_impl.1
= control target key start
LH: loop header
LB: loop body
LE: loop exit
PB: predicated region body
PF: predicated region fallthrough
CT: control target
= control target key end

     0   :  { %s1158_s0 = inlined_call_operand.vmem [shape: s32[8], index: 0, kind: input, shape index: {}]   ;;  %s1159_s1 = inlined_call_operand.vmem [shape: f32[64,32], index: 1, kind: input, shape index: {}]   ;;  %s1160_s2 = inlined_call_operand.vmem [shape: f32[1,32], index: 2, kind: input, shape index: {}]   ;;  %s1161_s3 = inlined_call_operand.vmem [shape: f32[10,32], index: 3, kind: input, shape index: {}]   ;;  %s1162_s4 = inlined_call_operand.hbm [shape: bf16[64,640], index: 4, kind: input, shape index: {}]   ;;  %s1163_s5 = inlined_call_operand.vmem [shape: f32[1,640], index: 5, kind: input, shape index: {}]   ;;  %s1164_s6 = inlined_call_operand.vmem [shape: f32[8,128], index: 6, kind: output, shape index: {}]  }
   0x1   :  { %s11_s23 = sshll.u32 %s1158_s0, 4  ;;  %s12_s23 = int_to_ptr.vmem [resolvable:$true] %s11_s23 }
   0x2   :  { %s923_s24 = scalar_lea.vmem %s12_s23, 16  ;;  %p928_p1 = scmp.lt.s32.totalorder %s12_s23, %s12_s23 }
   0x3   :  { %p924_p0 = scmp.ne.s32.totalorder %s12_s23, %s923_s24  ;;  %p929_p2 = scmp.lt.s32.totalorder %s923_s24, %s923_s24 }
   0x5   :  { %p930_p3 = por %p929_p2, %p928_p1 }
   0x7   :  { %p931_p4 = pnand %p930_p3, %p924_p0 }
   0x9   :  { %934 = shalt.err (!%p931_p4)  }
   0xa   :  { %s977_s25 = smov [#allocation4]  }
   0xb   :  { %14 = dma.vmem_to_smem %s12_s23, 16, %s977_s25, [#allocation3] }
   0xc   :  { %967 = dma.done.wait [#allocation3], 16 }
   0xd   :  { %968 = vsyncadd [#allocation3], 4294967280 }
   0xe   :  { %16 = sfence }
   0xf   :  { %17 = vsyncpa [#allocation6], 0  ;;  %s1027_s26 = smov 0  }
  0x10 LB: > { %s1033_s0 = sadd.s32 4294967295, %s975_s26   ;;  %p760_p5 = scmp.ge.s32.totalorder %s975_s26, 1  ;;  %s975_s26 = sphi %s1027_s26, %s23_s26  }
  0x11   : > { %p154_p6 = scmp.lt.s32.totalorder %s975_s26, 9  ;;  %s978_s27 = smov [#allocation5]  }
  0x12   : > { %s175_s28 = sshll.u32 %s978_s27, 4  ;;  %p1165_p9 = scmp.eq.s32.totalorder %s1033_s0, 0  ;;  %s176_s28 = int_to_ptr.vmem [resolvable:$true] %s175_s28 }
  0x13   : > { %p1038_p8 = pnand %p760_p5, %p154_p6  ;;  %s935_s9 = scalar_lea.hbm %s1162_s4, 2560 }
  0x14   : > { %p936_p12 = scmp.ne.s32.totalorder %s1162_s4, %s935_s9  ;;  %p942_p2 = scmp.lt.u32.totalorder %s935_s9, %s1162_s4 }
  0x15   : > { %s1167_s29 = scalar_select %p1038_p8, 1, 0 }
  0x16   : > { %p857_p10 = pneg %p1038_p8 }
  0x18   : > { %p1047_p11 = pnand %p1165_p9, %p857_p10 }
  0x1a   : > { %p937_p13 = pneg %p1047_p11 }
  0x1c   : > { %p938_p0 = pnand %p937_p13, %p936_p12 }
  0x1e   : > { %p939_p1 = pneg %p938_p0 }
  0x20   : > { %p944_p3 = pnand %p942_p2, %p939_p1 }
  0x22   : > { %947 = shalt.err (!%p944_p3)
}
  0x23   : > { %s948_s14 = scalar_lea.vmem %s176_s28, 2560  ;;  %p956_p10 = scmp.lt.s32.totalorder %s176_s28, %s176_s28 }
  0x24   : > { %p949_p4 = scmp.ne.s32.totalorder %s176_s28, %s948_s14  ;;  %p957_p7 = scmp.lt.s32.totalorder %s948_s14, %s948_s14 }
  0x26   : > { %p951_p5 = pnand %p949_p4, %p937_p13  ;;  %p958_p9 = por %p957_p7, %p956_p10 }
  0x28   : > { %p952_p6 = pneg %p951_p5 }
  0x2a   : > { %p959_p8 = pnand %p958_p9, %p952_p6 }
  0x2c   : > { %962 = shalt.err (!%p959_p8)
}
  0x2d   : > { %s979_s15 = smov 320   ;;  %s980_s16 = smov 20  }
  0x2e   : > { %860 = dma.hbm_to_vmem [thread:$0]  (!%p1047_p11), %s1162_s4, 2560, %s176_s28, [#allocation6], %s979_s15, %s979_s15, %s980_s16  }
  0x2f   : > { %p1169_p12 = scmp.ne.s32.totalorder %s1167_s29, 0 }
  0x30   : > { %p1170_p0 = scmp.eq.s32.totalorder (!%p1169_p12), %s1033_s0, 0 }
  0x31   : > { %194 = sbr.rel (%p1169_p12) target bundleno = 2519 (0x9d7), region = 40 }
  0x38   : > { %970 = dma.done.wait (%p1170_p0), [#allocation6], 2560   ;;  %p1171_p13 = pmov %p1170_p0 }
  0x39   : > { %p1172_p7 = scmp.ne.s32.totalorder %s1033_s0, 0 }
  0x3a   : > { %972 = vsyncadd (%p1171_p13), [#allocation6], 4294964736  ;;  %v217_v0 = vld [vmem:[%s1160_s2] sm:$0x1] (!%p1172_p7)  ;;  %vm218_vm0 = vcmask (!%p1172_p7), 253952  }
  0x3b   : > { %216 = sbr.rel (%p1172_p7) target bundleno = 66 (0x42), region = 48  ;;  %219 = vst.msk [vmem:[#allocation2] sm:$0x1] (!%p1172_p7), %vm218_vm0, %v217_v0 }
  0x42 PF: > { %v765_v1 = vld [vmem:[#allocation2] ss:$0 sm:$0xff]  ;;  %s981_s21 = smov 32   ;;  %v982_v2 = vmov 0.0   ;;  %v883_v3 = vld [vmem:[#allocation5] ss:$20 sps:$4 sm:$0xff]   ;;  %v539_v57 = vlaneseq  ;;  %s727_s19 = scalar_lea.vmem %s1164_s6, %s1033_s0 }
  0x43   : > { %229 = vrot.lane.b32.xlu0 %v765_v1, %s981_s21  ;;  %810 = vmatprep.subr.bf16.mxu0 %v982_v2  ;;  %v884_v4 = vld [vmem:[#allocation5 + $0x28] ss:$20 sps:$4 sm:$0xff]   ;;  %v885_v5 = vld [vmem:[#allocation5 + $0x50] ss:$20 sps:$4 sm:$0xff]   ;;  %vm983_vm1 = vmmov 0   ;;  %s220_s22 = sld [smem:[#allocation4 + %s1033_s0]] }
  0x44   : > { %811 = vmatpush3.bf16.msra.mxu0 %v883_v3  ;;  %818 = vmatprep.mubr.msk.bf16.mxu0 %vm983_vm1, %v982_v2  ;;  %v886_v6 = vld [vmem:[#allocation5 + $0x78] ss:$20 sps:$4 sm:$0xff]   ;;  %vm232_vm2 = vcmask 261120   ;;  %vm268_vm3 = vcmask 523264   ;;  %v243_v11 = vld [vmem:[%s1163_s5] sm:$0x1] }
  0x45   : > { %812 = vmatprep.subr.bf16.mxu0 %v982_v2  ;;  %826 = vmatprep.mubr.msk.f32.mxu1 %vm983_vm1, %v982_v2  ;;  %vm312_vm4 = vcmask 73728   ;;  %v324_v23 = vld [vmem:[%s1161_s3] sm:$0xff]  ;;  %v325_v24 = vld [vmem:[%s1161_s3 + $0x8] sm:$0x3]  ;;  %vm330_vm5 = vcmask 1041408   ;;  %v984_v25 = vmov 0.0|0.0  }
  0x46   : > { %849 = vmatprep.subr.bf16.mxu1 %v984_v25  ;;  %v850_v26 = vpack.c.bf16 %v325_v24, %v324_v23  ;;  %vm985_vm6 = vmmov 1   ;;  %vm326_vm8 = vcmask 80896   ;;  %v887_v30 = vld [vmem:[#allocation5 + $0x4] ss:$20 sps:$4 sm:$0xff]   ;;  %v888_v31 = vld [vmem:[#allocation5 + $0x2c] ss:$20 sps:$4 sm:$0xff]  }
  0x47   : > { %vm851_vm7 = vmpackc.low %vm330_vm5, %vm985_vm6  ;;  %v889_v32 = vld [vmem:[#allocation5 + $0x54] ss:$20 sps:$4 sm:$0xff]   ;;  %v890_v33 = vld [vmem:[#allocation5 + $0x7c] ss:$20 sps:$4 sm:$0xff]   ;;  %v986_v47 = vmov 0   ;;  %v540_v58 = vshrl.u32 %v539_v57, 7 }
  0x48   : > { %813 = vmatpush3.bf16.msra.mxu0 %v884_v4  ;;  %852 = vmatpush3.bf16.msk.msra.mxu1 %vm851_vm7, %v850_v26  ;;  %v891_v34 = vld [vmem:[#allocation5 + $0x8] ss:$20 sps:$4 sm:$0xff]   ;;  %v893_v35 = vld [vmem:[#allocation5 + $0xc] ss:$20 sps:$4 sm:$0xff]   ;;  %v894_v37 = vld [vmem:[#allocation5 + $0x30] ss:$20 sps:$4 sm:$0xff]  }
  0x49   : > { %814 = vmatprep.subr.bf16.mxu0 %v982_v2  ;;  %s221_s25 = scalar_lea.vmem %s1159_s1, %s220_s22  ;;  %829 = vmatprep.subr.bf16.mxu1 %v982_v2  ;;  %v896_v36 = vld [vmem:[#allocation5 + $0x34] ss:$20 sps:$4 sm:$0xff]   ;;  %v899_v43 = vld [vmem:[#allocation5 + $0x5c] ss:$20 sps:$4 sm:$0xff]   ;;  %v897_v44 = vld [vmem:[#allocation5 + $0x58] ss:$20 sps:$4 sm:$0xff]  }
  0x4a   : > { %v1091_v7 = vld [vmem:[%s221_s25] sm:$0x1]  ;;  %v902_v45 = vld [vmem:[#allocation5 + $0x84] ss:$20 sps:$4 sm:$0xff]   ;;  %v900_v46 = vld [vmem:[#allocation5 + $0x80] ss:$20 sps:$4 sm:$0xff]  }
  0x4b   : > { %v418_v48 = vld [vmem:[%s1163_s5 + $0x1] sm:$0x1]  ;;  %v541_v59 = vsub.s32 0, %v540_v58  ;;  %v497_v60 = vld [vmem:[%s1163_s5 + $0x2] sm:$0x3]  ;;  %v545_v62 = vsub.s32 1, %v540_v58 }
  0x4c   : > { %815 = vmatpush3.bf16.msra.mxu0 %v885_v5  ;;  %s987_s13 = smov 96   ;;  %s988_s14 = smov 64   ;;  %vm703_vm9 = vcmask 516096   ;;  %vm637_vm10 = vcmask 253952   ;;  %vm723_vm11 = vcmask 785408   ;;  %vm725_vm12 = vcmask 867328  }
  0x4d   : > { %816 = vmatprep.subr.bf16.mxu0 %v982_v2  ;;  %v542_v61 = vrot.slane %v497_v60, %v541_v59  ;;  %v546_v1 = vrot.slane %v497_v60, %v545_v62 }
  0x50   : > { %817 = vmatpush3.bf16.msra.mxu0 %v886_v6 }
  0x51   : > { %552 = vmatprep.subr.bf16.mxu0 %v893_v35 }
  0xb5   : > { %v1093_v8 = vpop.permute.xlu0 %229 }
  0xb6   : > { %v233_v9 = vsel %vm232_vm2, %v1091_v7, %v1093_v8 }
  0xb7   : > { %v234_v10 = vpack.c.bf16 %v233_v9, %v233_v9 }
  0xb9   : > { %819 = vmatmul.mubr.msk.bf16.vlgmr.msra.gmra.mrb[0].mxu0 %vm268_vm3, %v234_v10 }
  0xba   : > { %553 = vmatpush1.bf16.msra.mxu0 %v891_v34  ;;  %584 = vmatprep.mubr.bf16.mxu0 %v986_v47  ;;  %v644_v34 = vld [vmem:[%s1163_s5 + $0x4] sm:$0x1] }
  0xbb   : > { %554 = vmatprep.subr.bf16.mxu0 %v896_v36 }
  0xbe   : > { %555 = vmatpush1.bf16.msra.mxu0 %v894_v37 }
  0xbf   : > { %556 = vmatprep.subr.bf16.mxu0 %v899_v43 }
  0xc2   : > { %557 = vmatpush1.bf16.msra.mxu0 %v897_v44 }
  0xc3   : > { %558 = vmatprep.subr.bf16.mxu0 %v902_v45 }
  0xc6   : > { %559 = vmatpush1.bf16.msra.mxu0 %v900_v46 }
 0x18c   : > { %v306_v12 = vpop.f32.mrb[0].mxu0 }
 0x18d   : > { %v307_v13 = vadd.f32 %v306_v12, %v243_v11  ;;  %v820_v14 = vpop.f32.mrb[1].mxu0 }
 0x18e   : > { %v309_v15 = vpop.f32.mrb[2].mxu0 }
 0x18f   : > { %v821_v16 = vpop.f32.mrb[3].mxu0  ;;  %v313_v17 = vsel %vm312_vm4, %v307_v13, -inf }
 0x190   : > { %314 = vmax.xlane.f32.xlu0 %v313_v17 }
 0x21d   : > { %v315_v18 = vpop.xlane.xlu0 %314 }
 0x21e   : > { %v316_v19 = vsub.f32 %v307_v13, %v315_v18  ;;  %v903_v18 = vld [vmem:[#allocation5 + $0x10] ss:$20 sps:$4 sm:$0xff]  }
 0x220   : > { %v317_v20 = vmul.f32 1.442695, %v316_v19  ;;  %v904_v19 = vld [vmem:[#allocation5 + $0x38] ss:$20 sps:$4 sm:$0xff]  }
 0x222   : > { %905 = vpow2.f32 %v317_v20 }
 0x22c   : > { %v906_v21 = vpop.eup %905 }
 0x22d   : > { %v319_v22 = vsel %vm312_vm4, %v906_v21, 0.0 }
 0x22e   : > { %320 = vadd.xlane.f32.xlu1 %v319_v22 }
 0x2bb   : > { %v321_v27 = vpop.xlane.xlu1 %320 }
 0x2bc   : > { %907 = vrcp.f32 %v321_v27 }
 0x2c6   : > { %v908_v28 = vpop.eup %907 }
 0x2c7   : > { %v1109_v29 = vmul.f32 %v908_v28, %v906_v21 }
 0x2c9   : > { %827 = vmatmul.mubr.msk.f32.vlgmr.msra.gmra.mrb[0].mxu1 %vm326_vm8, %v1109_v29 }
 0x2ca   : > { %837 = vmatprep.mubr.msk.bf16.mxu1 %vm983_vm1, %v982_v2  ;;  %830 = vmatpush3.bf16.msra.mxu1 %v887_v30 }
 0x2cb   : > { %831 = vmatprep.subr.bf16.mxu1 %v982_v2 }
 0x2ce   : > { %832 = vmatpush3.bf16.msra.mxu1 %v888_v31 }
 0x2cf   : > { %833 = vmatprep.subr.bf16.mxu1 %v982_v2 }
 0x2d2   : > { %834 = vmatpush3.bf16.msra.mxu1 %v889_v32 }
 0x2d3   : > { %835 = vmatprep.subr.bf16.mxu1 %v982_v2 }
 0x2d6   : > { %836 = vmatpush3.bf16.msra.mxu1 %v890_v33 }
 0x2d7   : > { %841 = vmatprep.subr.bf16.mxu1 %v982_v2 }
 0x39c   : > { %v400_v38 = vpop.f32.mrb[0].mxu1 }
 0x39d   : > { %405 = vrot.lane.b32.xlu1 %v400_v38, %s981_s21  ;;  %v828_v39 = vpop.f32.mrb[1].mxu1 }
 0x40f   : > { %v406_v40 = vpop.permute.xlu1 %405 }
 0x410   : > { %v408_v41 = vsel %vm232_vm2, %v1091_v7, %v406_v40 }
 0x411   : > { %v409_v42 = vpack.c.bf16 %v408_v41, %v408_v41 }
 0x413   : > { %838 = vmatmul.mubr.msk.bf16.vlgmr.msra.gmra.mrb[4].mxu1 %vm268_vm3, %v409_v42 }
 0x414   : > { %845 = vmatprep.mubr.msk.bf16.mxu1 %vm983_vm1, %v982_v2  ;;  %842 = vmatpush3.bf16.msra.mxu1 %v903_v18 }
 0x415   : > { %843 = vmatprep.subr.bf16.mxu1 %v982_v2 }
 0x418   : > { %844 = vmatpush3.bf16.msra.mxu1 %v904_v19 }
 0x4e6   : > { %v480_v49 = vpop.f32.mrb[4].mxu1 }
 0x4e7   : > { %v481_v50 = vadd.f32 %v480_v49, %v418_v48  ;;  %v839_v51 = vpop.f32.mrb[5].mxu1 }
 0x4e8   : > { %v483_v52 = vpop.f32.mrb[6].mxu1 }
 0x4e9   : > { %v486_v53 = vmax.f32 %v481_v50, 0.0  ;;  %v840_v54 = vpop.f32.mrb[7].mxu1 }
 0x4eb   : > { %v487_v55 = vsel %vm232_vm2, %v486_v53, %v1093_v8 }
 0x4ec   : > { %v488_v56 = vpack.c.bf16 %v487_v55, %v487_v55 }
 0x4ee   : > { %786 = vmatmul.mubr.msk.bf16.vlgmr.msra.gmra.mrb[4].mxu0 %vm268_vm3, %v488_v56 }
 0x5c1   : > { %v586_v63 = vpop.f32.mrb[4].mxu0 }
 0x5c2   : > { %v587_v0 = vadd.f32 %v586_v63, %v542_v61  ;;  %v588_v3 = vpop.f32.mrb[5].mxu0 }
 0x5c3   : > { %v590_v4 = vpop.f32.mrb[6].mxu0  ;;  %v589_v6 = vadd.f32 %v588_v3, %v546_v1 }
 0x5c4   : > { %v591_v5 = vpop.f32.mrb[7].mxu0  ;;  %594 = vrot.lane.b32.xlu1 %v587_v0, %s981_s21 }
 0x5c8   : > { %615 = vrot.lane.b32.xlu1 %v589_v6, %s987_s13 }
 0x636   : > { %v595_v7 = vpop.permute.xlu1 %594 }
 0x637   : > { %v597_v9 = vadd.f32 %v595_v7, %v587_v0 }
 0x639   : > { %v787_v10 = vmul.f32 -1.442695, %v597_v9 }
 0x63a   : > { %v616_v14 = vpop.permute.xlu1 %615 }
 0x63b   : > { %909 = vpow2.f32 %v787_v10 }
 0x645   : > { %v910_v11 = vpop.eup %909 }
 0x646   : > { %v601_v12 = vadd.f32 1.0, %v910_v11 }
 0x648   : > { %911 = vrcp.f32 %v601_v12 }
 0x652   : > { %v912_v13 = vpop.eup %911 }
 0x653   : > { %v618_v15 = vmul.f32 %v912_v13, %v616_v14 }
 0x655   : > { %620 = vrot.lane.b32.xlu1 %v618_v15, %s988_s14 }
 0x659   : > { %605 = vrot.lane.b32.xlu1 %v589_v6, %s981_s21 }
 0x6c7   : > { %v621_v16 = vpop.permute.xlu1 %620 }
 0x6c8   : > { %v623_v17 = vadd.f32 %v621_v16, %v587_v0 }
 0x6ca   : > { %913 = vtanh.f32 %v623_v17 }
 0x6cb   : > { %v606_v21 = vpop.permute.xlu1 %605 }
 0x6cc   : > { %v608_v22 = vadd.f32 %v606_v21, %v587_v0 }
 0x6ce   : > { %v788_v23 = vmul.f32 -1.442695, %v608_v22 }
 0x6d0   : > { %915 = vpow2.f32 %v788_v23 }
 0x6d4   : > { %v914_v20 = vpop.eup %913 }
 0x6d5   : > { %627 = vrot.lane.b32.xlu0 %v914_v20, %s987_s13 }
 0x6da   : > { %v916_v24 = vpop.eup %915 }
 0x6db   : > { %v612_v25 = vadd.f32 1.0, %v916_v24 }
 0x6dd   : > { %917 = vrcp.f32 %v612_v25 }
 0x6e7   : > { %v918_v26 = vpop.eup %917 }
 0x6e8   : > { %v625_v27 = vsub.f32 1.0, %v918_v26  ;;  %v631_v31 = vmul.f32 %v918_v26, %v1093_v8 }
 0x747   : > { %v628_v28 = vpop.permute.xlu0 %627 }
 0x748   : > { %v630_v30 = vmul.f32 %v628_v28, %v625_v27 }
 0x74a   : > { %v632_v32 = vadd.f32 %v631_v31, %v630_v30 }
 0x74c   : > { %v639_v33 = vpack.c.bf16 %v632_v32, %v632_v32 }
 0x74e   : > { %646 = vrot.lane.b32.xlu1 %v639_v33, %s987_s13 }
 0x7c0   : > { %v647_v2 = vpop.permute.xlu1 %646 }
 0x7c1   : > { %846 = vmatmul.mubr.msk.bf16.vlgmr.msra.gmra.mrb[8].mxu1 %vm232_vm2, %v647_v2 }
 0x894   : > { %v697_v35 = vpop.f32.mrb[8].mxu1 }
 0x895   : > { %v698_v36 = vadd.f32 %v697_v35, %v644_v34  ;;  %v847_v37 = vpop.f32.mrb[9].mxu1 }
 0x896   : > { %v700_v38 = vpop.f32.mrb[10].mxu1 }
 0x897   : > { %v848_v39 = vpop.f32.mrb[11].mxu1  ;;  %v704_v40 = vsel %vm703_vm9, %v698_v36, -inf }
 0x898   : > { %705 = vmax.xlane.f32.xlu1 %v704_v40 }
 0x8a9   : > { %716 = vrot.lane.b32.xlu1 %v632_v32, %s981_s21 }
 0x8ad   : > { %634 = vrot.lane.b32.xlu1 %v632_v32, %s987_s13 }
 0x925   : > { %v706_v8 = vpop.xlane.xlu1 %705 }
 0x926   : > { %v707_v41 = vsub.f32 %v698_v36, %v706_v8 }
 0x928   : > { %v708_v42 = vmul.f32 1.442695, %v707_v41 }
 0x929   : > { %v717_v43 = vpop.permute.xlu1 %716 }
 0x92a   : > { %919 = vpow2.f32 %v708_v42 }
 0x92d   : > { %v635_v44 = vpop.permute.xlu1 %634 }
 0x92e   : > { %638 = vst.msk [vmem:[#allocation2] sm:$0x1] %vm637_vm10, %v635_v44 }
 0x934   : > { %v920_v45 = vpop.eup %919 }
 0x935   : > { %v710_v46 = vsel %vm703_vm9, %v920_v45, 0.0 }
 0x936   : > { %711 = vadd.xlane.f32.xlu0 %v710_v46 }
 0x94c   : > { %719 = vrot.lane.b32.xlu0 %v1109_v29, %s987_s13 }
 0x9c3   : > { %v712_v47 = vpop.xlane.xlu0 %711 }
 0x9c4   : > { %921 = vlog2.f32 %v712_v47 }
 0x9c7   : > { %v720_v51 = vpop.permute.xlu0 %719 }
 0x9ce   : > { %v922_v48 = vpop.eup %921 }
 0x9cf   : > { %v714_v49 = vmul.f32 0.6931472, %v922_v48 }
 0x9d1   : > { %v715_v50 = vsub.f32 %v707_v41, %v714_v49 }
 0x9d3   : > { %v722_v52 = vsel %vm268_vm3, %v715_v50, %v717_v43 }
 0x9d4   : > { %v724_v53 = vsel %vm723_vm11, %v722_v52, %v720_v51 }
 0x9d5   : > { %v726_v54 = vsel %vm725_vm12, %v724_v53, 0.0 }
 0x9d6   : > { %728 = vst [vmem:[%s727_s19] sm:$0x1] %v726_v54 }
 0x9d7 PF: > { %s23_s26 = sadd.s32 1, %s975_s26  }
 0x9d8   : > { %p20_p8 = scmp.ge.s32.totalorder %s23_s26, 10  }
 0x9da   :  { %22 = sbr.rel (!%p20_p8) target bundleno = 16 (0x10), region = 74 }
 0x9e1   :  { %740 = vsyncpa [#allocation6], 1 }
 0x9e2   :  { %742 = vsyncpa [#allocation6 + $0x1], 1 }

</bundles_post_ra>
